<compile_context>
chip_gen: v7x
topology: tpu7x:2x2x1
jax: 0.10.0
libtpu: 0.0.40
codegen_flags: <defaults>
</compile_context>

<pallas_src>
import jax
import jax.numpy as jnp
from jax.experimental import pallas as pl
from jax.experimental.pallas import tpu as pltpu


def _mish_kernel(x_ref, o_ref):
    """Elementwise Mish on one (TILE_ROWS, LANE) tile."""
    x = x_ref[...].astype(jnp.float32)
    # Numerically stable softplus (matches torch.nn.functional.softplus
    # within fp tolerance, including the large-x regime).
    sp = jax.nn.softplus(x)
    o_ref[...] = (x * jnp.tanh(sp)).astype(o_ref.dtype)


def mish(x, *, lane=512, max_tile_rows=1024):
    """Applies Mish elementwise to an array of any shape/dtype.

    The array is flattened, zero-padded to a lane-dense 2-D slab of shape
    (rows, lane) with rows a multiple of the row-tile, processed by a tiled
    Pallas kernel, then sliced back to the original shape.
    """
    orig_shape = x.shape
    dtype = x.dtype
    n = x.size

    flat = x.reshape(-1)

    # Rows needed to hold all elements at `lane` elements per row.
    rows_min = pl.cdiv(n, lane)
    # Row tile: multiple of 8 (sublane), capped so the double-buffered
    # working set stays a few MiB (v7x-safe).
    tile_rows = min(max_tile_rows, ((rows_min + 7) // 8) * 8)
    rows = pl.cdiv(rows_min, tile_rows) * tile_rows
    n_pad = rows * lane

    if n_pad != n:
        flat = jnp.pad(flat, (0, n_pad - n))
    x2d = flat.reshape(rows, lane)

    grid = (rows // tile_rows,)

    # Advisory cost hint: ~5 flops + 2 transcendentals per element,
    # one read + one write of the slab.
    elem_bytes = jnp.dtype(dtype).itemsize
    cost = pl.CostEstimate(
        flops=5 * n_pad,
        transcendentals=2 * n_pad,
        bytes_accessed=2 * n_pad * elem_bytes,
    )

    out2d = pl.pallas_call(
        _mish_kernel,
        out_shape=jax.ShapeDtypeStruct((rows, lane), dtype),
        grid_spec=pltpu.PrefetchScalarGridSpec(
            num_scalar_prefetch=0,
            grid=grid,
            in_specs=[pl.BlockSpec((tile_rows, lane), lambda i: (i, 0))],
            out_specs=pl.BlockSpec((tile_rows, lane), lambda i: (i, 0)),
        ),
        compiler_params=pltpu.CompilerParams(
            dimension_semantics=("parallel",)),
        cost_estimate=cost,
    )(x2d)

    return out2d.reshape(-1)[:n].reshape(orig_shape)


def _reference(x):
    """Pure-JAX reference mirroring the PyTorch module."""
    return x * jnp.tanh(jax.nn.softplus(x))


if __name__ == "__main__":
    key = jax.random.PRNGKey(0)
    # Small shape consistent with an elementwise activation in the encoder.
    x = jax.random.normal(key, (2, 4, 16, 16), dtype=jnp.float32) * 3.0

    out = mish(x)
    jax.block_until_ready(out)

    ref = _reference(x)
    assert out.shape == x.shape
    assert out.dtype == x.dtype
    assert jnp.allclose(out, ref, atol=1e-5, rtol=1e-5)

    print("KERNEL_OK")
</pallas_src>

<mosaic_0001>
module attributes {stable_mosaic.version = 11 : i64} {
  func.func @_mish_kernel(%arg0: i32, %arg1: memref<8x512xf32, #tpu.memory_space<vmem>>, %arg2: memref<8x512xf32, #tpu.memory_space<vmem>>) attributes {dimension_semantics = [#tpu.dimension_semantics<parallel>], iteration_bounds = array<i64: 1>, scalar_prefetch = 0 : i64, scratch_operands = 0 : i64, tpu.core_type = #tpu.core_type<tc>, window_params = [{transform_indices = @transform_0, window_bounds = array<i64: 8, 512>}, {transform_indices = @transform_1, window_bounds = array<i64: 8, 512>}]} {
    %c0 = arith.constant 0 : index
    %c0_0 = arith.constant 0 : index
    %0 = vector.load %arg1[%c0, %c0_0] : memref<8x512xf32, #tpu.memory_space<vmem>>, vector<8x512xf32>
    %cst = arith.constant 0.000000e+00 : f32
    %1 = vector.broadcast %cst : f32 to vector<8x512xf32>
    %2 = arith.maximumf %0, %1 : vector<8x512xf32>
    %3 = vector.broadcast %cst : f32 to vector<8x512xf32>
    %4 = arith.subf %0, %3 : vector<8x512xf32>
    %5 = arith.cmpf one, %4, %4 : vector<8x512xf32>
    %6 = vector.broadcast %cst : f32 to vector<8x512xf32>
    %7 = arith.addf %0, %6 : vector<8x512xf32>
    %8 = math.absf %4 : vector<8x512xf32>
    %cst_1 = arith.constant 0.000000e+00 : f32
    %9 = vector.broadcast %cst_1 : f32 to vector<8x512xf32>
    %10 = arith.subf %9, %8 : vector<8x512xf32>
    %11 = math.exp %10 : vector<8x512xf32>
    %12 = math.log1p %11 : vector<8x512xf32>
    %13 = arith.addf %2, %12 : vector<8x512xf32>
    %14 = arith.select %5, %7, %13 : vector<8x512xi1>, vector<8x512xf32>
    %15 = math.tanh %14 : vector<8x512xf32>
    %16 = arith.mulf %0, %15 : vector<8x512xf32>
    %c0_2 = arith.constant 0 : index
    %c0_3 = arith.constant 0 : index
    %17 = vector.load %arg2[%c0_2, %c0_3] : memref<8x512xf32, #tpu.memory_space<vmem>>, vector<8x512xf32>
    tpu.vector_store %arg2[%c0_2, %c0_3], %16 {strides = array<i32>} : memref<8x512xf32, #tpu.memory_space<vmem>>, vector<8x512xf32>,
    return
  }
  func.func @transform_0(%arg0: i32) -> (i32, i32) {
    %c0_i32 = arith.constant 0 : i32
    %c0_i32_0 = arith.constant 0 : i32
    return %arg0, %c0_i32 : i32, i32
  }
  func.func @transform_1(%arg0: i32) -> (i32, i32) {
    %c0_i32 = arith.constant 0 : i32
    %c0_i32_0 = arith.constant 0 : i32
    return %arg0, %c0_i32 : i32, i32
  }
}

</mosaic_0001>

<bundles_post_ra>
// kernel: tpu_custom_call.1
= control target key start
LH: loop header
LB: loop body
LE: loop exit
PB: predicated region body
PF: predicated region fallthrough
CT: control target
= control target key end

     0   :  { %6 = vsyncpa [#allocation3], 0  ;;  %s281_s0 = inlined_call_operand.hbm [shape: f32[8,512], index: 0, kind: input, shape index: {}]   ;;  %s282_s1 = inlined_call_operand.hbm [shape: f32[8,512], index: 1, kind: output, shape index: {}]  }
   0x1   :  { %7 = vsyncpa [#allocation4], 0  ;;  %s198_s6 = smov [#allocation2]   ;;  %s150_s10 = scalar_lea.hbm %s281_s0, 512 }
   0x2   :  { %s14_s7 = sshll.u32 %s198_s6, 4  ;;  %p151_p0 = scmp.ne.s32.totalorder %s281_s0, %s150_s10  ;;  %s15_s7 = int_to_ptr.vmem [resolvable:$true] %s14_s7 }
   0x3   :  { %p154_p1 = scmp.lt.u32.totalorder %s150_s10, %s281_s0 }
   0x5   :  { %p156_p2 = pnand %p154_p1, %p151_p0 }
   0x7   :  { %159 = shalt.err (!%p156_p2)
}
   0x8   :  { %s160_s15 = scalar_lea.vmem %s15_s7, 512  ;;  %p165_p4 = scmp.lt.s32.totalorder %s15_s7, %s15_s7 }
   0x9   :  { %p161_p3 = scmp.ne.s32.totalorder %s15_s7, %s160_s15  ;;  %p166_p5 = scmp.lt.s32.totalorder %s160_s15, %s160_s15 }
   0xb   :  { %p167_p6 = por %p166_p5, %p165_p4 }
   0xd   :  { %p168_p7 = pnand %p167_p6, %p161_p3 }
   0xf   :  { %171 = shalt.err (!%p168_p7)
}
  0x10   :  { %17 = dma.hbm_to_vmem [thread:$0]  %s281_s0, 512, %s15_s7, [#allocation3]  }
  0x11   :  { %194 = dma.done.wait [#allocation3], 512  }
  0x12   :  { %195 = vsyncadd [#allocation3], 4294966784  ;;  %v222_v0 = vld [vmem:[#allocation2] sm:$0xff]  ;;  %v224_v1 = vld [vmem:[#allocation2 + $0x8] sm:$0xff]  ;;  %s199_s0 = smov [#allocation5]  }
  0x13   :  { %v226_v2 = vld [vmem:[#allocation2 + $0x10] sm:$0xff]  ;;  %v37_v3 = vand.u32 2147483647, %v222_v0  ;;  %v229_v4 = vld [vmem:[#allocation2 + $0x18] sm:$0xff]  ;;  %v38_v5 = vand.u32 2147483647, %v224_v1  ;;  %vm29_vm2 = vcmp.ne.f32.partialorder %v222_v0, %v222_v0  ;;  %vm30_vm4 = vcmp.ne.f32.partialorder %v224_v1, %v224_v1 }
  0x14   :  { %v39_v7 = vand.u32 2147483647, %v226_v2  ;;  %v40_v9 = vand.u32 2147483647, %v229_v4  ;;  %v25_v37 = vmax.f32 %v222_v0, 0.0  ;;  %v26_v43 = vmax.f32 %v224_v1, 0.0 }
  0x15   :  { %v41_v6 = vsub.f32 0.0, %v37_v3  ;;  %v42_v8 = vsub.f32 0.0, %v38_v5  ;;  %v27_v48 = vmax.f32 %v226_v2, 0.0  ;;  %v28_v55 = vmax.f32 %v229_v4, 0.0  ;;  %s115_s18 = sshll.u32 %s199_s0, 4  ;;  %s116_s18 = int_to_ptr.vmem [resolvable:$true] %s115_s18 }
  0x16   :  { %v43_v11 = vsub.f32 0.0, %v39_v7  ;;  %v44_v13 = vsub.f32 0.0, %v40_v9  ;;  %vm31_vm6 = vcmp.ne.f32.partialorder %v226_v2, %v226_v2  ;;  %vm32_vm7 = vcmp.ne.f32.partialorder %v229_v4, %v229_v4  ;;  %s172_s19 = scalar_lea.vmem %s116_s18, 512  ;;  %p177_p9 = scmp.lt.s32.totalorder %s116_s18, %s116_s18 }
  0x17   :  { %v45_v10 = vmul.f32 1.442695, %v41_v6  ;;  %v47_v12 = vmul.f32 1.442695, %v42_v8  ;;  %p173_p8 = scmp.ne.s32.totalorder %s116_s18, %s172_s19  ;;  %p178_p10 = scmp.lt.s32.totalorder %s172_s19, %s172_s19 }
  0x18   :  { %v49_v14 = vmul.f32 1.442695, %v43_v11  ;;  %v51_v15 = vmul.f32 1.442695, %v44_v13 }
  0x19   :  { %126 = vpow2.f32 %v45_v10  ;;  %p179_p11 = por %p178_p10, %p177_p9 }
  0x1a   :  { %128 = vpow2.f32 %v47_v12 }
  0x1b   :  { %130 = vpow2.f32 %v49_v14  ;;  %p180_p12 = pnand %p179_p11, %p173_p8 }
  0x1c   :  { %132 = vpow2.f32 %v51_v15 }
  0x23   :  { %v127_v16 = vpop.eup %126 }
  0x24   :  { %v129_v17 = vpop.eup %128  ;;  %v53_v18 = vadd.f32 1.0, %v127_v16  ;;  %v56_v23 = vmul.f32 -0.5, %v127_v16  ;;  %v59_v29 = vand.u32 2147483647, %v127_v16 }
  0x25   :  { %v131_v19 = vpop.eup %130  ;;  %v62_v20 = vadd.f32 1.0, %v129_v17  ;;  %v65_v24 = vmul.f32 -0.5, %v129_v17  ;;  %v68_v31 = vand.u32 2147483647, %v129_v17 }
  0x26   :  { %v133_v21 = vpop.eup %132  ;;  %134 = vlog2.f32 %v53_v18  ;;  %v71_v22 = vadd.f32 1.0, %v131_v19  ;;  %v74_v26 = vmul.f32 -0.5, %v131_v19  ;;  %v57_v27 = vadd.f32 1.0, %v56_v23 }
  0x27   :  { %136 = vlog2.f32 %v62_v20  ;;  %v80_v25 = vadd.f32 1.0, %v133_v21  ;;  %v83_v28 = vmul.f32 -0.5, %v133_v21  ;;  %v66_v30 = vadd.f32 1.0, %v65_v24 }
  0x28   :  { %138 = vlog2.f32 %v71_v22  ;;  %v75_v32 = vadd.f32 1.0, %v74_v26  ;;  %v77_v33 = vand.u32 2147483647, %v131_v19  ;;  %v58_v34 = vmul.f32 %v127_v16, %v57_v27 }
  0x29   :  { %140 = vlog2.f32 %v80_v25  ;;  %v84_v35 = vadd.f32 1.0, %v83_v28  ;;  %vm235_vm0 = vcmp.lt.f32.partialorder %v59_v29, 0.0004427343  ;;  %v67_v39 = vmul.f32 %v129_v17, %v66_v30 }
  0x2a   :  { %v86_v40 = vand.u32 2147483647, %v133_v21  ;;  %vm240_vm1 = vcmp.lt.f32.partialorder %v68_v31, 0.0004427343  ;;  %v76_v45 = vmul.f32 %v131_v19, %v75_v32  ;;  %vm78_vm3 = vcmp.lt.f32.partialorder %v77_v33, 0.0004427343 }
  0x2b   :  { %v85_v51 = vmul.f32 %v133_v21, %v84_v35 }
  0x2c   :  { %vm87_vm5 = vcmp.lt.f32.partialorder %v86_v40, 0.0004427343 }
  0x30   :  { %v135_v36 = vpop.eup %134 }
  0x31   :  { %v137_v41 = vpop.eup %136  ;;  %v55_v42 = vmul.f32 0.6931472, %v135_v36 }
  0x32   :  { %v139_v46 = vpop.eup %138  ;;  %v64_v47 = vmul.f32 0.6931472, %v137_v41 }
  0x33   :  { %v61_v49 = vsel %vm235_vm0, %v58_v34, %v55_v42  ;;  %v73_v50 = vmul.f32 0.6931472, %v139_v46  ;;  %v141_v52 = vpop.eup %140 }
  0x34   :  { %v89_v53 = vadd.f32 %v61_v49, %v25_v37  ;;  %v70_v54 = vsel %vm240_vm1, %v67_v39, %v64_v47  ;;  %v82_v58 = vmul.f32 0.6931472, %v141_v52 }
  0x35   :  { %v90_v56 = vadd.f32 %v70_v54, %v26_v43  ;;  %v79_v57 = vsel %vm78_vm3, %v76_v45, %v73_v50 }
  0x36   :  { %v93_v59 = vsel %vm29_vm2, %v222_v0, %v89_v53  ;;  %v91_v60 = vadd.f32 %v79_v57, %v27_v48  ;;  %v88_v62 = vsel %vm87_vm5, %v85_v51, %v82_v58 }
  0x37   :  { %142 = vtanh.f32 %v93_v59  ;;  %v94_v61 = vsel %vm30_vm4, %v224_v1, %v90_v56  ;;  %v92_v3 = vadd.f32 %v88_v62, %v28_v55 }
  0x38   :  { %144 = vtanh.f32 %v94_v61  ;;  %v95_v63 = vsel %vm31_vm6, %v226_v2, %v91_v60 }
  0x39   :  { %146 = vtanh.f32 %v95_v63  ;;  %v96_v5 = vsel %vm32_vm7, %v229_v4, %v92_v3 }
  0x3a   :  { %148 = vtanh.f32 %v96_v5 }
  0x41   :  { %v143_v6 = vpop.eup %142 }
  0x42   :  { %v145_v7 = vpop.eup %144  ;;  %v101_v8 = vmul.f32 %v143_v6, %v222_v0 }
  0x43   :  { %v147_v9 = vpop.eup %146  ;;  %v102_v10 = vmul.f32 %v145_v7, %v224_v1 }
  0x44   :  { %105 = vst [vmem:[#allocation5] sm:$0xff] %v101_v8  ;;  %v103_v11 = vmul.f32 %v147_v9, %v226_v2  ;;  %v149_v12 = vpop.eup %148 }
  0x45   :  { %106 = vst [vmem:[#allocation5 + $0x8] sm:$0xff] %v102_v10  ;;  %v104_v13 = vmul.f32 %v149_v12, %v229_v4 }
  0x46   :  { %107 = vst [vmem:[#allocation5 + $0x10] sm:$0xff] %v103_v11 }
  0x47   :  { %108 = vst [vmem:[#allocation5 + $0x18] sm:$0xff] %v104_v13 }
  0x48   :  { %183 = shalt.err (!%p180_p12)
}
  0x49   :  { %s184_s22 = scalar_lea.hbm %s282_s1, 512 }
  0x4a   :  { %p185_p13 = scmp.ne.s32.totalorder %s282_s1, %s184_s22  ;;  %p188_p0 = scmp.lt.u32.totalorder %s184_s22, %s282_s1 }
  0x4c   :  { %p190_p1 = pnand %p188_p0, %p185_p13 }
  0x4e   :  { %193 = shalt.err (!%p190_p1)
}
  0x4f   :  { %118 = dma.vmem_to_hbm [thread:$0]  %s116_s18, 512, %s282_s1, [#allocation4]  }
  0x50   :  { %196 = dma.done.wait [#allocation4], 512  }
  0x51   :  { %197 = vsyncadd [#allocation4], 4294966784 }
  0x52   :  { %122 = vsyncpa [#allocation3], 1 }
  0x53   :  { %123 = vsyncpa [#allocation4], 1 }

</bundles_post_ra>
